<compile_context>
chip_gen: v7x
topology: tpu7x:2x2x1
jax: 0.10.0
libtpu: 0.0.40
codegen_flags: <defaults>
</compile_context>

<pallas_src>
import jax
import jax.numpy as jnp
from jax.experimental import pallas as pl
from jax.experimental.pallas import tpu as pltpu


def _round_up(x, m):
    return (x + m - 1) // m * m


def _tm_vmem_cap(K, N, in_itemsize, out_itemsize, budget_bytes=24 * 1024 * 1024):
    """Largest row tile that keeps double-buffered x/out tiles plus the
    resident (double-buffered) weight and bias inside a conservative VMEM
    budget (safe under v7x's 32 MiB default scoped limit)."""
    fixed = 2 * K * N * in_itemsize + 2 * N * 4          # weight + bias buffers
    per_row = 2 * K * in_itemsize + 2 * N * out_itemsize  # x + out buffers
    cap = (budget_bytes - fixed) // max(per_row, 1)
    return max(16, min(1024, (cap // 16) * 16))


def _pick_tm(M, tm_cap):
    """Row tile: multiple of 16 (bf16 sublane packing), as large as the VMEM
    cap allows (fewer grid steps -> less ~0.35us/step overhead, bigger DMA
    bursts), preferring an exact divisor of M (no pad, no trailing slice) that
    leaves >= 2 grid steps so both v7x TensorCores are fed."""
    if M <= 16:
        return _round_up(max(M, 1), 8)            # tiny input: one small step
    best = 0
    t = 16
    limit = min(M // 2, tm_cap)
    while t <= limit:
        if M % t == 0:
            best = t
        t += 16
    if best:
        return best
    # No 16-aligned exact divisor: fall back to padding M.
    if M >= 2 * tm_cap:
        return max(128, (tm_cap // 128) * 128)    # large M: big aligned tile
    return min(_round_up((M + 1) // 2, 16), tm_cap)   # two balanced steps


def _patch_embed_kernel(x_ref, w_ref, b_ref, o_ref):
    # x_ref: (tm, K) bf16, w_ref: (K, N) bf16, b_ref: (1, N) f32, o_ref: (tm, N)
    acc = jnp.dot(x_ref[...], w_ref[...], preferred_element_type=jnp.float32)
    o_ref[...] = (acc + b_ref[...]).astype(o_ref.dtype)


def patch_embed(x, weight, bias, patch_size, *, compute_dtype=jnp.bfloat16,
                out_dtype=None):
    """x: (B, C, H, W) NCHW float32.
    weight: (embed_dim, C, P, P) -- PyTorch Conv2d layout.
    bias:   (embed_dim,)
    returns (B, num_patches, embed_dim) in out_dtype (default: x.dtype)."""
    B, C, H, W = x.shape
    P = patch_size
    E = weight.shape[0]
    Hp, Wp = H // P, W // P
    num_patches = Hp * Wp
    out_dtype = x.dtype if out_dtype is None else out_dtype

    # --- wrapper glue: extract non-overlapping patches in (c, kh, kw) order.
    # Under jit this is a single fused XLA pass (f32 read + bf16 write).
    # Intentional precision choice: the contraction runs on bf16 operands with
    # f32 accumulation (vs PyTorch's f32 conv).
    xc = x.astype(compute_dtype)
    xp = xc.reshape(B, C, Hp, P, Wp, P)
    xp = jnp.transpose(xp, (0, 2, 4, 1, 3, 5))            # (B, Hp, Wp, C, P, P)
    x2d = xp.reshape(B * num_patches, C * P * P)           # (M, K)

    # weight (E, C, P, P) -> (K, E); bias stays f32 for the f32 accumulator.
    w2d = weight.reshape(E, C * P * P).T.astype(compute_dtype)
    b2d = bias.reshape(1, E).astype(jnp.float32)

    M, K = x2d.shape
    N = E

    # Row tile from VMEM budget; no K/N padding needed (full-extent blocks).
    tm_cap = _tm_vmem_cap(K, N, jnp.dtype(compute_dtype).itemsize,
                          jnp.dtype(out_dtype).itemsize)
    tm = _pick_tm(M, tm_cap)
    Mp = _round_up(M, tm)
    if Mp != M:  # rare: only when no 16-aligned divisor of M exists
        x2d = jnp.pad(x2d, ((0, Mp - M), (0, 0)))
    grid_m = Mp // tm

    cost = pl.CostEstimate(
        flops=2 * Mp * K * N,
        transcendentals=0,
        bytes_accessed=(Mp * K * jnp.dtype(compute_dtype).itemsize
                        + K * N * jnp.dtype(compute_dtype).itemsize
                        + N * 4
                        + Mp * N * jnp.dtype(out_dtype).itemsize),
    )

    out2d = pl.pallas_call(
        _patch_embed_kernel,
        out_shape=jax.ShapeDtypeStruct((Mp, N), out_dtype),
        grid_spec=pltpu.PrefetchScalarGridSpec(
            num_scalar_prefetch=0,
            grid=(grid_m,),
            in_specs=[
                pl.BlockSpec((tm, K), lambda i: (i, 0)),   # x rows, full K
                pl.BlockSpec((K, N), lambda i: (0, 0)),    # resident weight
                pl.BlockSpec((1, N), lambda i: (0, 0)),    # resident bias
            ],
            out_specs=pl.BlockSpec((tm, N), lambda i: (i, 0)),
        ),
        compiler_params=pltpu.CompilerParams(
            dimension_semantics=("parallel",)),
        cost_estimate=cost,
    )(x2d, w2d, b2d)

    if Mp != M:
        out2d = out2d[:M]
    return out2d.reshape(B, num_patches, E)


def patch_embed_ref(x, weight, bias, patch_size):
    """Pure-JAX f32 reference (conv via lax.conv_general_dilated)."""
    out = jax.lax.conv_general_dilated(
        x, weight,
        window_strides=(patch_size, patch_size),
        padding="VALID",
        dimension_numbers=("NCHW", "OIHW", "NCHW"),
    ) + bias.reshape(1, -1, 1, 1)
    B, E, Hp, Wp = out.shape
    return jnp.transpose(out.reshape(B, E, Hp * Wp), (0, 2, 1))


if __name__ == "__main__":
    # Small shapes consistent with the module.
    image_size = 16
    patch_size = 4
    input_channels = 4
    embed_dimension = 128
    batch = 2

    key = jax.random.PRNGKey(0)
    kx, kw, kb = jax.random.split(key, 3)

    x = jax.random.normal(kx, (batch, input_channels, image_size, image_size),
                          dtype=jnp.float32)
    # Conv2d weight shape: (out, in, P, P).
    fan_in = input_channels * patch_size * patch_size
    weight = jax.random.normal(
        kw, (embed_dimension, input_channels, patch_size, patch_size),
        dtype=jnp.float32) * (1.0 / fan_in) ** 0.5
    bias = jax.random.normal(kb, (embed_dimension,), dtype=jnp.float32) * 0.01

    # jit so the cast+transpose glue fuses into a single HBM pass.
    fn = jax.jit(patch_embed, static_argnames=("patch_size",))
    out = fn(x, weight, bias, patch_size=patch_size)
    out = jax.block_until_ready(out)

    # Sanity check against pure-JAX f32 reference (bf16 operands -> looser tol).
    ref = jax.block_until_ready(patch_embed_ref(x, weight, bias, patch_size))
    assert out.shape == (batch, (image_size // patch_size) ** 2, embed_dimension)
    assert jnp.allclose(out, ref, atol=3e-2, rtol=3e-2), "mismatch vs reference"

    print("KERNEL_OK")
</pallas_src>

<mosaic_0001>
module attributes {stable_mosaic.version = 11 : i64} {
  func.func @_patch_embed_kernel(%arg0: i32, %arg1: memref<16x64xbf16, #tpu.memory_space<vmem>>, %arg2: memref<64x128xbf16, #tpu.memory_space<vmem>>, %arg3: memref<1x128xf32, #tpu.memory_space<vmem>>, %arg4: memref<16x128xf32, #tpu.memory_space<vmem>>) attributes {dimension_semantics = [#tpu.dimension_semantics<parallel>], iteration_bounds = array<i64: 2>, scalar_prefetch = 0 : i64, scratch_operands = 0 : i64, tpu.core_type = #tpu.core_type<tc>, window_params = [{transform_indices = @transform_0, window_bounds = array<i64: 16, 64>}, {pipeline_mode = #tpu.pipeline_mode<synchronous>, transform_indices = @transform_1, window_bounds = array<i64: 64, 128>}, {pipeline_mode = #tpu.pipeline_mode<synchronous>, transform_indices = @transform_2, window_bounds = array<i64: 1, 128>}, {transform_indices = @transform_3, window_bounds = array<i64: 16, 128>}]} {
    %c0 = arith.constant 0 : index
    %c0_0 = arith.constant 0 : index
    %0 = vector.load %arg1[%c0, %c0_0] : memref<16x64xbf16, #tpu.memory_space<vmem>>, vector<16x64xbf16>
    %c0_1 = arith.constant 0 : index
    %c0_2 = arith.constant 0 : index
    %1 = vector.load %arg2[%c0_1, %c0_2] : memref<64x128xbf16, #tpu.memory_space<vmem>>, vector<64x128xbf16>
    %cst = arith.constant dense<0.000000e+00> : vector<16x128xf32>
    %2 = tpu.matmul %0, %1, %cst {dimension_numbers = #tpu.dot_dimension_numbers<[1], [0], [0], [1], [0, 0, 1, 1], [], []>} : vector<16x64xbf16>, vector<64x128xbf16>, vector<16x128xf32> -> vector<16x128xf32>
    %c0_3 = arith.constant 0 : index
    %c0_4 = arith.constant 0 : index
    %3 = vector.load %arg3[%c0_3, %c0_4] : memref<1x128xf32, #tpu.memory_space<vmem>>, vector<1x128xf32>
    %4 = vector.broadcast %3 : vector<1x128xf32> to vector<16x128xf32>
    %5 = arith.addf %2, %4 : vector<16x128xf32>
    %c0_5 = arith.constant 0 : index
    %c0_6 = arith.constant 0 : index
    %6 = vector.load %arg4[%c0_5, %c0_6] : memref<16x128xf32, #tpu.memory_space<vmem>>, vector<16x128xf32>
    tpu.vector_store %arg4[%c0_5, %c0_6], %5 {strides = array<i32>} : memref<16x128xf32, #tpu.memory_space<vmem>>, vector<16x128xf32>,
    return
  }
  func.func @transform_0(%arg0: i32) -> (i32, i32) {
    %c0_i32 = arith.constant 0 : i32
    %c0_i32_0 = arith.constant 0 : i32
    return %arg0, %c0_i32 : i32, i32
  }
  func.func @transform_1(%arg0: i32) -> (i32, i32) {
    %c0_i32 = arith.constant 0 : i32
    %c0_i32_0 = arith.constant 0 : i32
    %c0_i32_1 = arith.constant 0 : i32
    return %c0_i32, %c0_i32_0 : i32, i32
  }
  func.func @transform_2(%arg0: i32) -> (i32, i32) {
    %c0_i32 = arith.constant 0 : i32
    %c0_i32_0 = arith.constant 0 : i32
    %c0_i32_1 = arith.constant 0 : i32
    return %c0_i32, %c0_i32_0 : i32, i32
  }
  func.func @transform_3(%arg0: i32) -> (i32, i32) {
    %c0_i32 = arith.constant 0 : i32
    %c0_i32_0 = arith.constant 0 : i32
    return %arg0, %c0_i32 : i32, i32
  }
}

</mosaic_0001>

<bundles_post_ra>
// kernel: patch_embed.1
= control target key start
LH: loop header
LB: loop body
LE: loop exit
PB: predicated region body
PF: predicated region fallthrough
CT: control target
= control target key end

     0   :  { %8 = vsyncpa [#allocation3], 0  ;;  %s633_s0 = inlined_call_operand.vmem [shape: bf16[32,64], index: 0, kind: input, shape index: {}]   ;;  %s634_s1 = inlined_call_operand.vmem [shape: bf16[64,128], index: 1, kind: input, shape index: {}]   ;;  %s635_s2 = inlined_call_operand.vmem [shape: f32[1,128], index: 2, kind: input, shape index: {}]   ;;  %s636_s3 = inlined_call_operand.hbm [shape: f32[32,128], index: 3, kind: output, shape index: {}]  }
   0x1   :  { %10 = vsyncpa [#allocation3 + $0x1], 0  ;;  %s516_s12 = smov 0   ;;  %s518_s13 = smov 0  }
   0x2   :  { %s520_s14 = smov 0   ;;  %s522_s15 = smov 0  }
   0x3 LB: > { %s537_s16 = sadd.s32 4294967295, %s489_s15   ;;  %s342_s17 = sadd.s32 4294967294, %s489_s15   ;;  %s489_s15 = sphi %s522_s15, %s642_s15   ;;  %s485_s14 = sphi %s520_s14, %s641_s14   ;;  %s481_s13 = sphi %s518_s13, %s640_s13   ;;  %s477_s12 = sphi %s516_s12, %s639_s12  }
   0x4   : > { %s541_s18 = sadd.s32 1, %s489_s15   ;;  %s91_s19 = sadd.s32 1, %s485_s14 }
   0x5   : > { %s88_s20 = ssub.s32 %s489_s15, %s541_s18  ;;  %p101_p0 = scmp.ne.s32.totalorder %s485_s14, %s481_s13 }
   0x6   : > { %p89_p1 = scmp.eq.s32.totalorder %s88_s20, 0  ;;  %p102_p2 = scmp.eq.s32.totalorder %s537_s16, 1 }
   0x7   : > { %p107_p3 = scmp.ne.s32.totalorder %s481_s13, %s477_s12  ;;  %p108_p4 = scmp.eq.s32.totalorder %s342_s17, 1 }
   0x8   : > { %s552_s21 = scalar_select %p89_p1, %s485_s14, %s91_s19  }
   0x9   : > { %p554_p5 = por %p102_p2, %p101_p0  ;;  %p558_p6 = por %p108_p4, %p107_p3 }
   0xa   : > { %p345_p7 = scmp.ge.s32.totalorder %s489_s15, 1  ;;  %p141_p8 = scmp.lt.s32.totalorder %s489_s15, 3 }
   0xc   : > { %p142_p9 = pnand %p345_p7, %p141_p8 }
   0xd   : > { %v422_v0 = vld [vmem:[%s634_s1] sm:$0xff] (!%p142_p9)   ;;  %v491_v1 = vmov (!%p142_p9), 0.0   ;;  %v423_v2 = vld [vmem:[%s634_s1 + $0x8] sm:$0xff] (!%p142_p9)   ;;  %vm492_vm0 = vmmov (!%p142_p9), 0   ;;  %s347_s28 = sshll.u32 (!%p142_p9), %s537_s16, 1  ;;  %v424_v3 = vld [vmem:[%s634_s1 + $0x10] sm:$0xff] (!%p142_p9)  }
   0xe   : > { %145 = sbr.rel (%p142_p9) target bundleno = 261 (0x105), region = 32  ;;  %367 = vmatprep.subr.bf16.mxu0 (!%p142_p9), %v491_v1  ;;  %375 = vmatprep.mubr.msk.bf16.mxu0 (!%p142_p9), %vm492_vm0, %v491_v1  ;;  %p166_p10 = scmp.lt.s32.totalorder (!%p142_p9), %s347_s28, 3  ;;  %v425_v4 = vld [vmem:[%s634_s1 + $0x18] sm:$0xff] (!%p142_p9)   ;;  %vm219_vm1 = vcmask (!%p142_p9), 523264   ;;  %v349_v6 = vld [vmem:[%s635_s2] ss:$0 sm:$0xff] (!%p142_p9) }
   0xf   : > { %368 = vmatpush3.bf16.msra.mxu0 (!%p142_p9), %v422_v0  ;;  %s162_s10 = sand.u32 (!%p142_p9), 1, %s481_s13   ;;  %s361_s25 = sshll.u32 (!%p142_p9), %s537_s16, 8 }
  0x10   : > { %369 = vmatprep.subr.bf16.mxu0 (!%p142_p9), %v491_v1  ;;  %s346_s11 = sshll.u32 (!%p142_p9), %s162_s10, 4  ;;  %s592_s29 = scalar_lea.sflag (!%p142_p9), [#allocation3], %s162_s10 }
  0x11   : > { %s164_s20 = scalar_lea.vmem (!%p142_p9), [#allocation2], %s346_s11  ;;  %s493_s30 = smov (!%p142_p9), [#allocation2]  }
  0x12   : > { %s280_s24 = sshll.u32 (!%p142_p9), %s164_s20, 4  ;;  %s585_s24 = int_to_ptr.vmem [resolvable:$true] %s280_s24 }
  0x13   : > { %370 = vmatpush3.bf16.msra.mxu0 (!%p142_p9), %v423_v2  ;;  %s427_s16 = scalar_lea.vmem (!%p142_p9), %s585_s24, 256 }
  0x14   : > { %371 = vmatprep.subr.bf16.mxu0 (!%p142_p9), %v491_v1  ;;  %p428_p11 = scmp.ne.s32.totalorder (!%p142_p9), %s585_s24, %s427_s16 }
  0x15   : > { %s644_s28 = smov (!%p166_p10, %s347_s28), 3 }
  0x16   : > { %s348_s4 = sshll.u32 %s644_s28, 2  ;;  %s590_s28 = scalar_lea.hbm %s636_s3, %s361_s25 }
  0x17   : > { %s169_s7 = scalar_lea.vmem %s633_s0, %s348_s4  ;;  %372 = vmatpush3.bf16.msra.mxu0 %v424_v3  ;;  %p429_p12 = pnand %p428_p11, %p554_p5 }
  0x18   : > { %373 = vmatprep.subr.bf16.mxu0 %v491_v1  ;;  %v426_v5 = vld [vmem:[%s169_s7] sm:$0xff]   ;;  %s431_s4 = sshll.u32 %s493_s30, 4  ;;  %s432_s4 = int_to_ptr.vmem [resolvable:$false] %s431_s4 }
  0x19   : > { %p430_p13 = pneg %p429_p12  ;;  %s433_s5 = scalar_lea.vmem %s432_s4, 512 }
  0x1a   : > { %p434_p0 = scmp.lt.s32.totalorder %s585_s24, %s432_s4  ;;  %p435_p1 = scmp.lt.s32.totalorder %s433_s5, %s427_s16 }
  0x1b   : > { %374 = vmatpush3.bf16.msra.mxu0 %v425_v4 }
  0x1c   : > { %p436_p2 = por %p435_p1, %p434_p0 }
  0x1e   : > { %376 = vmatmul.mubr.msk.bf16.vlgmr.msra.gmra.mrb[0].mxu0 %vm219_vm1, %v426_v5  ;;  %p437_p3 = pnand %p436_p2, %p430_p13 }
  0xf1   : > { %v257_v7 = vpop.f32.mrb[0].mxu0 }
  0xf2   : > { %v258_v8 = vadd.f32 %v349_v6, %v257_v7  ;;  %v377_v9 = vpop.f32.mrb[1].mxu0 }
  0xf3   : > { %v260_v10 = vpop.f32.mrb[2].mxu0 }
  0xf4   : > { %264 = vst [vmem:[%s164_s20] sm:$0xff] %v258_v8  ;;  %v261_v11 = vadd.f32 %v349_v6, %v260_v10  ;;  %v378_v12 = vpop.f32.mrb[3].mxu0 }
  0xf6   : > { %265 = vst [vmem:[%s164_s20 + $0x8] sm:$0xff] %v261_v11 }
  0xf7   : > { %440 = shalt.err (!%p437_p3)
}
  0xf8   : > { %s441_s6 = scalar_lea.hbm %s590_s28, 256  ;;  %s445_s9 = scalar_lea.hbm %s636_s3, 512 }
  0xf9   : > { %p442_p4 = scmp.ne.s32.totalorder %s590_s28, %s441_s6  ;;  %p446_p9 = scmp.lt.u32.totalorder %s590_s28, %s636_s3 }
  0xfa   : > { %p447_p10 = scmp.lt.u32.totalorder %s445_s9, %s441_s6  ;;  %p449_p12 = scmp.lt.u32.totalorder %s441_s6, %s590_s28 }
  0xfb   : > { %p443_p7 = pnand %p442_p4, %p554_p5 }
  0xfc   : > { %p448_p11 = por %p447_p10, %p446_p9 }
  0xfd   : > { %p444_p8 = pneg %p443_p7 }
  0xfe   : > { %p450_p13 = por %p449_p12, %p448_p11 }
 0x100   : > { %p451_p0 = pnand %p450_p13, %p444_p8 }
 0x102   : > { %454 = shalt.err (!%p451_p0)
}
 0x103   : > { %s494_s17 = smov 128   ;;  %s495_s19 = smov 8  }
 0x104   : > { %379 = dma.vmem_to_hbm [thread:$0]  (%p554_p5), %s585_s24, 256, %s590_s28, %s592_s29, %s494_s17, %s494_s17, %s495_s19  }
 0x105 PF: > { %p385_p1 = scmp.ge.s32.totalorder %s489_s15, 2  ;;  %s295_s20 = sand.u32 1, %s477_s12  }
 0x106   : > { %s296_s25 = scalar_lea.sflag [#allocation3], %s295_s20 }
 0x107   : > { %p382_p2 = pnand %p385_p1, %p558_p6 }
 0x109   : > { %472 = dma.done.wait (!%p382_p2), %s296_s25, 256  }
 0x10a   : > { %474 = vsyncadd (!%p382_p2), %s296_s25, 4294967040  ;;  %p13_p3 = scmp.ge.s32.totalorder %s541_s18, 4   ;;  %s639_s12 = smov %s481_s13 }
 0x10b   : > { %s640_s13 = smov %s485_s14  ;;  %s641_s14 = smov %s552_s21 }
 0x10c   : > { %s642_s15 = smov %s541_s18  ;;  %15 = sbr.rel (!%p13_p3) target bundleno = 3 (0x3), region = 67 }
 0x113   :  { %301 = vsyncpa [#allocation3], 1 }
 0x114   :  { %303 = vsyncpa [#allocation3 + $0x1], 1 }

</bundles_post_ra>
